<compile_context>
chip_gen: v5e
topology: v5e:2x2
jax: 0.10.0
libtpu: 0.0.40
codegen_flags: <defaults>
</compile_context>

<pallas_src>
import functools

import jax
import jax.numpy as jnp
from jax.experimental import pallas as pl
from jax.experimental.pallas import tpu as pltpu

_MIB = 1024 * 1024


def _vmem_budget_bytes():
    """Per-core VMEM budget for tiles + scratch, with compile-safe headroom."""
    cap = None
    try:
        cap = getattr(pltpu.get_tpu_info(), "vmem_capacity_bytes", None)
    except Exception:
        cap = None
    if not cap:
        cap = 64 * _MIB                      # conservative: v7x per-core capacity
    # 3/4 of physical, capped at 48 MiB (safe on v5e/v6e/v7x).
    return int(min(cap * 3 // 4, 48 * _MIB))


def _pick_hw_tile(C, HW, itemsize, budget_bytes):
    """Spatial (lane) tile for the two-pass path: full HW if small, else a
    multiple of 128 sized so 2x-in + 2x-out double-buffered tiles fit the budget."""
    target = max(2 * _MIB, min(8 * _MIB, budget_bytes // 8))
    max_lanes = max(128, target // max(1, C * itemsize))
    if HW <= max_lanes:
        return HW
    return max(128, (max_lanes // 128) * 128)


def _conv7_relu(pad_ref, w1_ref, v, C):
    """ReLU(7-tap zero-padded cross-correlation along the channel/sublane axis).

    out[c] = sum_k w1[k] * v[c + k - 3], zeros outside [0, C).  Matches
    Conv2d(1, 1, (1, 7), padding=(0, 3), bias=False) applied along the channel dim.
    """
    pad_ref[...] = jnp.zeros_like(pad_ref)
    pad_ref[pl.ds(3, C), :] = v
    out = w1_ref[0] * pad_ref[pl.ds(0, C), :]
    for k in range(1, 7):
        out = out + w1_ref[k] * pad_ref[pl.ds(k, C), :]
    return jnp.maximum(out, 0.0)


# ----------------------------------------------------------------------------
# Fused single-pass kernel: pool -> conv -> sigmoid -> multiply on one slab.
# ----------------------------------------------------------------------------
def _fused_kernel(w1_ref, w2_ref, x_ref, o_ref, pad_ref):
    C, HW = x_ref.shape[1], x_ref.shape[2]
    x = x_ref[0]                                              # (C, HW), native dtype
    xf = x.astype(jnp.float32)
    avg = jnp.sum(xf, axis=-1, keepdims=True) * (1.0 / HW)    # (C, 1)
    mx = jnp.max(xf, axis=-1, keepdims=True)                  # (C, 1)
    ca = _conv7_relu(pad_ref, w1_ref, avg, C)
    cm = _conv7_relu(pad_ref, w1_ref, mx, C)
    attn = jax.nn.sigmoid(w2_ref[0] * ca + w2_ref[1] * cm)    # (C, 1) f32
    if o_ref.dtype == jnp.float32:
        o_ref[0] = xf * attn
    else:
        # bf16-native multiply on v6e/v7x: cast attn once, no f32 slab temp.
        o_ref[0] = (x * attn.astype(x.dtype)).astype(o_ref.dtype)


# ----------------------------------------------------------------------------
# Two-pass fallback: streaming pool + attn, then streaming apply.
# ----------------------------------------------------------------------------
def _pool_attn_kernel(w1_ref, w2_ref, x_ref, attn_ref,
                      sum_ref, max_ref, pad_ref, *, hw_total, ragged):
    t = pl.program_id(1)
    n_t = pl.num_programs(1)
    C, t_hw = x_ref.shape[1], x_ref.shape[2]

    @pl.when(t == 0)
    def _init():
        sum_ref[...] = jnp.zeros_like(sum_ref)
        max_ref[...] = jnp.full_like(max_ref, -jnp.inf)

    x = x_ref[0].astype(jnp.float32)                          # (C, t_hw)

    def _accumulate(xv):
        sum_ref[...] += jnp.sum(xv, axis=-1, keepdims=True)
        max_ref[...] = jnp.maximum(max_ref[...],
                                   jnp.max(xv, axis=-1, keepdims=True))

    if not ragged:
        _accumulate(x)
    else:
        # Unmasked accumulation on interior tiles; mask only the ragged last tile.
        @pl.when(t < n_t - 1)
        def _interior():
            _accumulate(x)

        @pl.when(t == n_t - 1)
        def _last():
            lane = jax.lax.broadcasted_iota(jnp.int32, x.shape, 1)
            valid = (t * t_hw + lane) < hw_total
            sum_ref[...] += jnp.sum(jnp.where(valid, x, 0.0),
                                    axis=-1, keepdims=True)
            max_ref[...] = jnp.maximum(
                max_ref[...],
                jnp.max(jnp.where(valid, x, -jnp.inf), axis=-1, keepdims=True))

    @pl.when(t == n_t - 1)
    def _finalize():
        avg = sum_ref[...] * (1.0 / hw_total)                 # (C, 1)
        ca = _conv7_relu(pad_ref, w1_ref, avg, C)
        cm = _conv7_relu(pad_ref, w1_ref, max_ref[...], C)
        attn_ref[0] = jax.nn.sigmoid(w2_ref[0] * ca + w2_ref[1] * cm)


def _apply_kernel(attn_ref, x_ref, o_ref):
    x = x_ref[0]                                              # (C, t_hw), native dtype
    attn = attn_ref[0]                                        # (C, 1) f32
    if o_ref.dtype == jnp.float32:
        o_ref[0] = x.astype(jnp.float32) * attn
    else:
        o_ref[0] = (x * attn.astype(x.dtype)).astype(o_ref.dtype)


# ----------------------------------------------------------------------------
# Jitted runners.
# ----------------------------------------------------------------------------
@functools.partial(jax.jit, static_argnames=("vmem_limit",))
def _run_fused(xr, w1f, w2f, *, vmem_limit):
    B, C, HW = xr.shape
    return pl.pallas_call(
        _fused_kernel,
        grid=(B,),
        in_specs=[
            pl.BlockSpec(memory_space=pltpu.MemorySpace.SMEM),       # w1 (7,)
            pl.BlockSpec(memory_space=pltpu.MemorySpace.SMEM),       # w2 (2,)
            pl.BlockSpec((1, C, HW), lambda b: (b, 0, 0)),           # x slab
        ],
        out_specs=pl.BlockSpec((1, C, HW), lambda b: (b, 0, 0)),
        out_shape=jax.ShapeDtypeStruct((B, C, HW), xr.dtype),
        scratch_shapes=[pltpu.VMEM((C + 6, 1), jnp.float32)],        # conv pad buffer
        compiler_params=pltpu.CompilerParams(
            dimension_semantics=("parallel",),
            vmem_limit_bytes=vmem_limit),
    )(w1f, w2f, xr)


@functools.partial(jax.jit, static_argnames=("t_hw", "vmem_limit"))
def _run_two_pass(xr, w1f, w2f, *, t_hw, vmem_limit):
    B, C, HW = xr.shape
    n_hw = pl.cdiv(HW, t_hw)
    ragged = (HW % t_hw) != 0

    attn = pl.pallas_call(
        functools.partial(_pool_attn_kernel, hw_total=HW, ragged=ragged),
        grid=(B, n_hw),
        in_specs=[
            pl.BlockSpec(memory_space=pltpu.MemorySpace.SMEM),       # w1 (7,)
            pl.BlockSpec(memory_space=pltpu.MemorySpace.SMEM),       # w2 (2,)
            pl.BlockSpec((1, C, t_hw), lambda b, t: (b, 0, t)),      # x tiles
        ],
        out_specs=pl.BlockSpec((1, C, 1), lambda b, t: (b, 0, 0)),   # attn (resident)
        out_shape=jax.ShapeDtypeStruct((B, C, 1), jnp.float32),
        scratch_shapes=[
            pltpu.VMEM((C, 1), jnp.float32),       # running sum
            pltpu.VMEM((C, 1), jnp.float32),       # running max
            pltpu.VMEM((C + 6, 1), jnp.float32),   # zero-padded conv buffer
        ],
        compiler_params=pltpu.CompilerParams(
            dimension_semantics=("parallel", "arbitrary"),
            vmem_limit_bytes=vmem_limit),
    )(w1f, w2f, xr)

    out = pl.pallas_call(
        _apply_kernel,
        grid=(B, n_hw),
        in_specs=[
            pl.BlockSpec((1, C, 1), lambda b, t: (b, 0, 0)),         # attn
            pl.BlockSpec((1, C, t_hw), lambda b, t: (b, 0, t)),      # x tiles
        ],
        out_specs=pl.BlockSpec((1, C, t_hw), lambda b, t: (b, 0, t)),
        out_shape=jax.ShapeDtypeStruct((B, C, HW), xr.dtype),
        compiler_params=pltpu.CompilerParams(
            dimension_semantics=("parallel", "parallel"),
            vmem_limit_bytes=vmem_limit),
    )(attn, xr)
    return out


def channel_block(x, w1, w2, *, hw_tile=None, force_two_pass=False):
    """ChannelBlock forward: x * sigmoid(fc0(cat(avgpool(x), maxpool(x))))."""
    B, C, H, W = x.shape
    HW = H * W
    xr = x.reshape(B, C, HW)                       # native dtype on the wire
    w1f = w1.astype(jnp.float32)
    w2f = w2.astype(jnp.float32)
    itemsize = jnp.dtype(x.dtype).itemsize
    budget = _vmem_budget_bytes()

    # Fused path needs: 2x double-buffered input + 2x output slabs, plus one f32
    # slab of headroom for in-kernel temporaries, plus a small margin.
    slab = C * HW * itemsize
    fused_need = 4 * slab + C * HW * 4 + 2 * _MIB
    use_fused = (not force_two_pass) and (hw_tile is None) and (fused_need <= budget)

    if use_fused:
        out = _run_fused(xr, w1f, w2f, vmem_limit=budget)
    else:
        t_hw = hw_tile if hw_tile is not None else _pick_hw_tile(C, HW, itemsize,
                                                                 budget)
        out = _run_two_pass(xr, w1f, w2f, t_hw=t_hw, vmem_limit=budget)
    return out.reshape(B, C, H, W)


def channel_block_ref(x, w1, w2):
    """Pure-JAX reference mirroring the PyTorch module (explicit 7-tap conv)."""
    B, C, H, W = x.shape
    xf = x.astype(jnp.float32)
    avg = jnp.mean(xf, axis=(2, 3))                  # (B, C)
    mx = jnp.max(xf, axis=(2, 3))                    # (B, C)
    pad = jnp.zeros((B, 3), jnp.float32)
    ap = jnp.concatenate([pad, avg, pad], axis=-1)   # (B, C+6)
    mp = jnp.concatenate([pad, mx, pad], axis=-1)
    ca = sum(w1[k] * ap[:, k:k + C] for k in range(7))
    cm = sum(w1[k] * mp[:, k:k + C] for k in range(7))
    ca = jnp.maximum(ca, 0.0)
    cm = jnp.maximum(cm, 0.0)
    attn = jax.nn.sigmoid(w2[0] * ca + w2[1] * cm)   # (B, C)
    return (xf * attn[:, :, None, None]).astype(x.dtype)


if __name__ == "__main__":
    key = jax.random.PRNGKey(0)
    kx, k1, k2, kx2 = jax.random.split(key, 4)

    # Deterministic synthetic weights (PyTorch-Conv2d-style uniform init).
    b1 = 1.0 / jnp.sqrt(7.0)
    b2 = 1.0 / jnp.sqrt(2.0)
    w1 = jax.random.uniform(k1, (7,), minval=-b1, maxval=b1, dtype=jnp.float32)
    w2 = jax.random.uniform(k2, (2,), minval=-b2, maxval=b2, dtype=jnp.float32)

    # Case 1: toy shape — default path (fused, slab fits VMEM).
    x = jax.random.normal(kx, (2, 4, 16, 16), dtype=jnp.float32)
    ref = channel_block_ref(x, w1, w2)
    out = channel_block(x, w1, w2)
    jax.block_until_ready(out)
    assert out.shape == x.shape
    assert jnp.allclose(out, ref, atol=1e-5, rtol=1e-5), "mismatch (fused)"

    # Case 1b: same input, forced two-pass fallback (single non-ragged tile).
    out_tp = channel_block(x, w1, w2, force_two_pass=True)
    jax.block_until_ready(out_tp)
    assert jnp.allclose(out_tp, ref, atol=1e-5, rtol=1e-5), "mismatch (two-pass)"

    # Case 2: ragged multi-tile spatial axis (exercises masking + streaming
    # sum/max accumulation of the fallback), plus the fused path on a
    # non-128-aligned full-HW block.
    x2 = jax.random.normal(kx2, (2, 8, 16, 18), dtype=jnp.float32)
    ref2 = channel_block_ref(x2, w1, w2)
    out2 = channel_block(x2, w1, w2, hw_tile=128)        # forces two-pass, ragged
    jax.block_until_ready(out2)
    assert jnp.allclose(out2, ref2, atol=1e-5, rtol=1e-5), "mismatch (ragged)"
    out2f = channel_block(x2, w1, w2)                    # fused, HW=288
    jax.block_until_ready(out2f)
    assert jnp.allclose(out2f, ref2, atol=1e-5, rtol=1e-5), "mismatch (fused ragged)"

    print("KERNEL_OK")
</pallas_src>

<mosaic_0001>
module attributes {stable_mosaic.version = 11 : i64} {
  func.func @_fused_kernel(%arg0: i32, %arg1: memref<7xf32, #tpu.memory_space<smem>>, %arg2: memref<2xf32, #tpu.memory_space<smem>>, %arg3: memref<1x4x256xf32, #tpu.memory_space<vmem>>, %arg4: memref<1x4x256xf32, #tpu.memory_space<vmem>>, %arg5: memref<10x1xf32, #tpu.memory_space<vmem>>) attributes {dimension_semantics = [#tpu.dimension_semantics<parallel>], iteration_bounds = array<i64: 2>, scalar_prefetch = 0 : i64, scratch_operands = 1 : i64, tpu.core_type = #tpu.core_type<tc>, window_params = [{transform_indices = @transform_0, window_bounds = array<i64: 7>}, {transform_indices = @transform_1, window_bounds = array<i64: 2>}, {transform_indices = @transform_2, window_bounds = array<i64: 1, 4, 256>}, {transform_indices = @transform_3, window_bounds = array<i64: 1, 4, 256>}]} {
    %c0 = arith.constant 0 : index
    %c0_0 = arith.constant 0 : index
    %c0_1 = arith.constant 0 : index
    %0 = vector.load %arg3[%c0, %c0_0, %c0_1] : memref<1x4x256xf32, #tpu.memory_space<vmem>>, vector<1x4x256xf32>
    %1 = vector.shape_cast %0 : vector<1x4x256xf32> to vector<4x256xf32>
    %cst = arith.constant dense<0.000000e+00> : vector<4xf32>
    %2 = vector.multi_reduction <add>, %1, %cst [1] : vector<4x256xf32> to vector<4xf32>
    %3 = vector.shape_cast %2 : vector<4xf32> to vector<4x1xf32>
    %cst_2 = arith.constant 3.906250e-03 : f32
    %4 = vector.broadcast %cst_2 : f32 to vector<4x1xf32>
    %5 = arith.mulf %3, %4 : vector<4x1xf32>
    %cst_3 = arith.constant dense<0xFF800000> : vector<4xf32>
    %6 = vector.multi_reduction <maximumf>, %1, %cst_3 [1] : vector<4x256xf32> to vector<4xf32>
    %7 = vector.shape_cast %6 : vector<4xf32> to vector<4x1xf32>
    %cst_4 = arith.constant 0.000000e+00 : f32
    %8 = vector.broadcast %cst_4 : f32 to vector<10x1xf32>
    %c0_5 = arith.constant 0 : index
    %c0_6 = arith.constant 0 : index
    %9 = vector.load %arg5[%c0_5, %c0_6] : memref<10x1xf32, #tpu.memory_space<vmem>>, vector<10x1xf32>
    tpu.vector_store %arg5[%c0_5, %c0_6], %8 {strides = array<i32>} : memref<10x1xf32, #tpu.memory_space<vmem>>, vector<10x1xf32>,
    %c3 = arith.constant 3 : index
    %c0_7 = arith.constant 0 : index
    %10 = vector.load %arg5[%c3, %c0_7] : memref<10x1xf32, #tpu.memory_space<vmem>>, vector<4x1xf32>
    tpu.vector_store %arg5[%c3, %c0_7], %5 {strides = array<i32>} : memref<10x1xf32, #tpu.memory_space<vmem>>, vector<4x1xf32>,
    %c0_8 = arith.constant 0 : index
    %11 = memref.load %arg1[%c0_8] : memref<7xf32, #tpu.memory_space<smem>>
    %c0_9 = arith.constant 0 : index
    %c0_10 = arith.constant 0 : index
    %12 = vector.load %arg5[%c0_9, %c0_10] : memref<10x1xf32, #tpu.memory_space<vmem>>, vector<4x1xf32>
    %13 = vector.broadcast %11 : f32 to vector<4x1xf32>
    %14 = arith.mulf %13, %12 : vector<4x1xf32>
    %c1 = arith.constant 1 : index
    %15 = memref.load %arg1[%c1] : memref<7xf32, #tpu.memory_space<smem>>
    %c1_11 = arith.constant 1 : index
    %c0_12 = arith.constant 0 : index
    %16 = vector.load %arg5[%c1_11, %c0_12] : memref<10x1xf32, #tpu.memory_space<vmem>>, vector<4x1xf32>
    %17 = vector.broadcast %15 : f32 to vector<4x1xf32>
    %18 = arith.mulf %17, %16 : vector<4x1xf32>
    %19 = arith.addf %14, %18 : vector<4x1xf32>
    %c2 = arith.constant 2 : index
    %20 = memref.load %arg1[%c2] : memref<7xf32, #tpu.memory_space<smem>>
    %c2_13 = arith.constant 2 : index
    %c0_14 = arith.constant 0 : index
    %21 = vector.load %arg5[%c2_13, %c0_14] : memref<10x1xf32, #tpu.memory_space<vmem>>, vector<4x1xf32>
    %22 = vector.broadcast %20 : f32 to vector<4x1xf32>
    %23 = arith.mulf %22, %21 : vector<4x1xf32>
    %24 = arith.addf %19, %23 : vector<4x1xf32>
    %c3_15 = arith.constant 3 : index
    %25 = memref.load %arg1[%c3_15] : memref<7xf32, #tpu.memory_space<smem>>
    %c3_16 = arith.constant 3 : index
    %c0_17 = arith.constant 0 : index
    %26 = vector.load %arg5[%c3_16, %c0_17] : memref<10x1xf32, #tpu.memory_space<vmem>>, vector<4x1xf32>
    %27 = vector.broadcast %25 : f32 to vector<4x1xf32>
    %28 = arith.mulf %27, %26 : vector<4x1xf32>
    %29 = arith.addf %24, %28 : vector<4x1xf32>
    %c4 = arith.constant 4 : index
    %30 = memref.load %arg1[%c4] : memref<7xf32, #tpu.memory_space<smem>>
    %c4_18 = arith.constant 4 : index
    %c0_19 = arith.constant 0 : index
    %31 = vector.load %arg5[%c4_18, %c0_19] : memref<10x1xf32, #tpu.memory_space<vmem>>, vector<4x1xf32>
    %32 = vector.broadcast %30 : f32 to vector<4x1xf32>
    %33 = arith.mulf %32, %31 : vector<4x1xf32>
    %34 = arith.addf %29, %33 : vector<4x1xf32>
    %c5 = arith.constant 5 : index
    %35 = memref.load %arg1[%c5] : memref<7xf32, #tpu.memory_space<smem>>
    %c5_20 = arith.constant 5 : index
    %c0_21 = arith.constant 0 : index
    %36 = vector.load %arg5[%c5_20, %c0_21] : memref<10x1xf32, #tpu.memory_space<vmem>>, vector<4x1xf32>
    %37 = vector.broadcast %35 : f32 to vector<4x1xf32>
    %38 = arith.mulf %37, %36 : vector<4x1xf32>
    %39 = arith.addf %34, %38 : vector<4x1xf32>
    %c6 = arith.constant 6 : index
    %40 = memref.load %arg1[%c6] : memref<7xf32, #tpu.memory_space<smem>>
    %c6_22 = arith.constant 6 : index
    %c0_23 = arith.constant 0 : index
    %41 = vector.load %arg5[%c6_22, %c0_23] : memref<10x1xf32, #tpu.memory_space<vmem>>, vector<4x1xf32>
    %42 = vector.broadcast %40 : f32 to vector<4x1xf32>
    %43 = arith.mulf %42, %41 : vector<4x1xf32>
    %44 = arith.addf %39, %43 : vector<4x1xf32>
    %cst_24 = arith.constant 0.000000e+00 : f32
    %45 = vector.broadcast %cst_24 : f32 to vector<4x1xf32>
    %46 = arith.maximumf %44, %45 : vector<4x1xf32>
    %cst_25 = arith.constant 0.000000e+00 : f32
    %47 = vector.broadcast %cst_25 : f32 to vector<10x1xf32>
    %c0_26 = arith.constant 0 : index
    %c0_27 = arith.constant 0 : index
    %48 = vector.load %arg5[%c0_26, %c0_27] : memref<10x1xf32, #tpu.memory_space<vmem>>, vector<10x1xf32>
    tpu.vector_store %arg5[%c0_26, %c0_27], %47 {strides = array<i32>} : memref<10x1xf32, #tpu.memory_space<vmem>>, vector<10x1xf32>,
    %c3_28 = arith.constant 3 : index
    %c0_29 = arith.constant 0 : index
    %49 = vector.load %arg5[%c3_28, %c0_29] : memref<10x1xf32, #tpu.memory_space<vmem>>, vector<4x1xf32>
    tpu.vector_store %arg5[%c3_28, %c0_29], %7 {strides = array<i32>} : memref<10x1xf32, #tpu.memory_space<vmem>>, vector<4x1xf32>,
    %c0_30 = arith.constant 0 : index
    %50 = memref.load %arg1[%c0_30] : memref<7xf32, #tpu.memory_space<smem>>
    %c0_31 = arith.constant 0 : index
    %c0_32 = arith.constant 0 : index
    %51 = vector.load %arg5[%c0_31, %c0_32] : memref<10x1xf32, #tpu.memory_space<vmem>>, vector<4x1xf32>
    %52 = vector.broadcast %50 : f32 to vector<4x1xf32>
    %53 = arith.mulf %52, %51 : vector<4x1xf32>
    %c1_33 = arith.constant 1 : index
    %54 = memref.load %arg1[%c1_33] : memref<7xf32, #tpu.memory_space<smem>>
    %c1_34 = arith.constant 1 : index
    %c0_35 = arith.constant 0 : index
    %55 = vector.load %arg5[%c1_34, %c0_35] : memref<10x1xf32, #tpu.memory_space<vmem>>, vector<4x1xf32>
    %56 = vector.broadcast %54 : f32 to vector<4x1xf32>
    %57 = arith.mulf %56, %55 : vector<4x1xf32>
    %58 = arith.addf %53, %57 : vector<4x1xf32>
    %c2_36 = arith.constant 2 : index
    %59 = memref.load %arg1[%c2_36] : memref<7xf32, #tpu.memory_space<smem>>
    %c2_37 = arith.constant 2 : index
    %c0_38 = arith.constant 0 : index
    %60 = vector.load %arg5[%c2_37, %c0_38] : memref<10x1xf32, #tpu.memory_space<vmem>>, vector<4x1xf32>
    %61 = vector.broadcast %59 : f32 to vector<4x1xf32>
    %62 = arith.mulf %61, %60 : vector<4x1xf32>
    %63 = arith.addf %58, %62 : vector<4x1xf32>
    %c3_39 = arith.constant 3 : index
    %64 = memref.load %arg1[%c3_39] : memref<7xf32, #tpu.memory_space<smem>>
    %c3_40 = arith.constant 3 : index
    %c0_41 = arith.constant 0 : index
    %65 = vector.load %arg5[%c3_40, %c0_41] : memref<10x1xf32, #tpu.memory_space<vmem>>, vector<4x1xf32>
    %66 = vector.broadcast %64 : f32 to vector<4x1xf32>
    %67 = arith.mulf %66, %65 : vector<4x1xf32>
    %68 = arith.addf %63, %67 : vector<4x1xf32>
    %c4_42 = arith.constant 4 : index
    %69 = memref.load %arg1[%c4_42] : memref<7xf32, #tpu.memory_space<smem>>
    %c4_43 = arith.constant 4 : index
    %c0_44 = arith.constant 0 : index
    %70 = vector.load %arg5[%c4_43, %c0_44] : memref<10x1xf32, #tpu.memory_space<vmem>>, vector<4x1xf32>
    %71 = vector.broadcast %69 : f32 to vector<4x1xf32>
    %72 = arith.mulf %71, %70 : vector<4x1xf32>
    %73 = arith.addf %68, %72 : vector<4x1xf32>
    %c5_45 = arith.constant 5 : index
    %74 = memref.load %arg1[%c5_45] : memref<7xf32, #tpu.memory_space<smem>>
    %c5_46 = arith.constant 5 : index
    %c0_47 = arith.constant 0 : index
    %75 = vector.load %arg5[%c5_46, %c0_47] : memref<10x1xf32, #tpu.memory_space<vmem>>, vector<4x1xf32>
    %76 = vector.broadcast %74 : f32 to vector<4x1xf32>
    %77 = arith.mulf %76, %75 : vector<4x1xf32>
    %78 = arith.addf %73, %77 : vector<4x1xf32>
    %c6_48 = arith.constant 6 : index
    %79 = memref.load %arg1[%c6_48] : memref<7xf32, #tpu.memory_space<smem>>
    %c6_49 = arith.constant 6 : index
    %c0_50 = arith.constant 0 : index
    %80 = vector.load %arg5[%c6_49, %c0_50] : memref<10x1xf32, #tpu.memory_space<vmem>>, vector<4x1xf32>
    %81 = vector.broadcast %79 : f32 to vector<4x1xf32>
    %82 = arith.mulf %81, %80 : vector<4x1xf32>
    %83 = arith.addf %78, %82 : vector<4x1xf32>
    %cst_51 = arith.constant 0.000000e+00 : f32
    %84 = vector.broadcast %cst_51 : f32 to vector<4x1xf32>
    %85 = arith.maximumf %83, %84 : vector<4x1xf32>
    %c0_52 = arith.constant 0 : index
    %86 = memref.load %arg2[%c0_52] : memref<2xf32, #tpu.memory_space<smem>>
    %87 = vector.broadcast %86 : f32 to vector<4x1xf32>
    %88 = arith.mulf %87, %46 : vector<4x1xf32>
    %c1_53 = arith.constant 1 : index
    %89 = memref.load %arg2[%c1_53] : memref<2xf32, #tpu.memory_space<smem>>
    %90 = vector.broadcast %89 : f32 to vector<4x1xf32>
    %91 = arith.mulf %90, %85 : vector<4x1xf32>
    %92 = arith.addf %88, %91 : vector<4x1xf32>
    %93 = arith.negf %92 : vector<4x1xf32>
    %94 = math.exp %93 : vector<4x1xf32>
    %cst_54 = arith.constant 1.000000e+00 : f32
    %95 = vector.broadcast %cst_54 : f32 to vector<4x1xf32>
    %96 = arith.addf %95, %94 : vector<4x1xf32>
    %97 = arith.divf %95, %96 : vector<4x1xf32>
    %98 = vector.broadcast %97 : vector<4x1xf32> to vector<4x256xf32>
    %99 = arith.mulf %1, %98 : vector<4x256xf32>
    %c0_55 = arith.constant 0 : index
    %c0_56 = arith.constant 0 : index
    %c0_57 = arith.constant 0 : index
    %100 = vector.load %arg4[%c0_55, %c0_56, %c0_57] : memref<1x4x256xf32, #tpu.memory_space<vmem>>, vector<1x4x256xf32>
    %101 = vector.shape_cast %100 : vector<1x4x256xf32> to vector<4x256xf32>
    %102 = vector.shape_cast %99 : vector<4x256xf32> to vector<1x4x256xf32>
    tpu.vector_store %arg4[%c0_55, %c0_56, %c0_57], %102 {strides = array<i32>} : memref<1x4x256xf32, #tpu.memory_space<vmem>>, vector<1x4x256xf32>,
    return
  }
  func.func @transform_0(%arg0: i32) -> i32 {
    %c0_i32 = arith.constant 0 : i32
    %c0_i32_0 = arith.constant 0 : i32
    return %c0_i32 : i32
  }
  func.func @transform_1(%arg0: i32) -> i32 {
    %c0_i32 = arith.constant 0 : i32
    %c0_i32_0 = arith.constant 0 : i32
    return %c0_i32 : i32
  }
  func.func @transform_2(%arg0: i32) -> (i32, i32, i32) {
    %c0_i32 = arith.constant 0 : i32
    %c0_i32_0 = arith.constant 0 : i32
    %c0_i32_1 = arith.constant 0 : i32
    return %arg0, %c0_i32, %c0_i32_0 : i32, i32, i32
  }
  func.func @transform_3(%arg0: i32) -> (i32, i32, i32) {
    %c0_i32 = arith.constant 0 : i32
    %c0_i32_0 = arith.constant 0 : i32
    %c0_i32_1 = arith.constant 0 : i32
    return %arg0, %c0_i32, %c0_i32_0 : i32, i32, i32
  }
}

</mosaic_0001>

<bundles_post_ra>
// kernel: _run_fused.1
= control target key start
LH: loop header
LB: loop body
LE: loop exit
PB: predicated region body
PF: predicated region fallthrough
CT: control target
= control target key end

     0   :  { %8 = vsyncpa [#allocation6], 0  ;;  %s916_s0 = inlined_call_operand.hbm [shape: f32[7], index: 0, kind: input, shape index: {}]   ;;  %s917_s1 = inlined_call_operand.vmem [shape: f32[2], index: 1, kind: input, shape index: {}]   ;;  %s918_s2 = inlined_call_operand.hbm [shape: f32[2,4,256], index: 2, kind: input, shape index: {}]   ;;  %s919_s3 = inlined_call_operand.hbm [shape: f32[2,4,256], index: 3, kind: output, shape index: {}]  }
   0x1   :  { %9 = vsyncpa [#allocation7], 0 }
   0x2   :  { %10 = vsyncpa [#allocation4], 0 }
   0x3   :  { %12 = vsyncpa [#allocation4 + $0x1], 0 }
   0x4   :  { %13 = vsyncpa [#allocation5], 0 }
   0x5   :  { %15 = vsyncpa [#allocation5 + $0x1], 0  ;;  %s738_s12 = smov 0   ;;  %s740_s13 = smov 0  }
   0x6   :  { %s742_s14 = smov 0   ;;  %s744_s15 = smov 0  }
   0x7 LB: > { %s759_s16 = sadd.s32 4294967295, %s711_s15   ;;  %s467_s17 = sadd.s32 4294967294, %s711_s15   ;;  %s711_s15 = sphi %s744_s15, %s929_s15   ;;  %s707_s14 = sphi %s742_s14, %s928_s14   ;;  %s703_s13 = sphi %s740_s13, %s927_s13   ;;  %s699_s12 = sphi %s738_s12, %s926_s12  }
   0x8   : > { %p83_p0 = scmp.ne.s32.totalorder %s703_s13, %s699_s12  ;;  %p84_p1 = scmp.eq.s32.totalorder %s759_s16, 0 }
   0x9   : > { %p107_p2 = scmp.eq.s32.totalorder %s759_s16, 1  ;;  %p113_p3 = scmp.eq.s32.totalorder %s467_s17, 1 }
   0xa   : > { %p768_p4 = por %p84_p1, %p83_p0  ;;  %p468_p5 = scmp.ge.s32.totalorder %s711_s15, 1 }
   0xb   : > { %p773_p6 = por %p113_p3, %p83_p0  ;;  %p120_p7 = scmp.lt.s32.totalorder %s711_s15, 3 }
   0xc   : > { %s132_s22 = sshll.u32 %s916_s0, 4  ;;  %s142_s26 = sshll.u32 %s917_s1, 4  ;;  %s133_s22 = int_to_ptr.hbm [resolvable:$true] %s132_s22  ;;  %s143_s26 = int_to_ptr.vmem [resolvable:$true] %s142_s26 }
   0xd   : > { %p781_p8 = pnand %p468_p5, %p120_p7  ;;  %s794_s27 = sadd.s32 1, %s711_s15  }
   0xe   : > { %s67_s28 = ssub.s32 %s711_s15, %s794_s27  ;;  %s713_s29 = smov [#allocation3]  }
   0xf   : > { %p513_p10 = pneg %p781_p8  ;;  %s714_s30 = smov [#allocation8]  }
  0x10   : > { %p68_p12 = scmp.eq.s32.totalorder %s67_s28, 0  ;;  %s70_s4 = sadd.s32 1, %s707_s14 }
  0x11   : > { %p514_p11 = pnand %p513_p10, %p84_p1  ;;  %p77_p13 = scmp.ne.s32.totalorder %s707_s14, %s703_s13 }
  0x12   : > { %p78_p0 = scmp.eq.s32.totalorder %s711_s15, 0  ;;  %p530_p7 = scmp.lt.s32.totalorder %s711_s15, 2 }
  0x13   : > { %516 = dma.hbm_to_smem (!%p514_p11), %s133_s22, 16, %s713_s29, [#allocation6]  }
  0x14   : > { %519 = dma.vmem_to_smem (!%p514_p11), %s143_s26, 16, %s714_s30, [#allocation7]  }
  0x15   : > { %s803_s5 = scalar_select %p68_p12, %s707_s14, %s70_s4  }
  0x16   : > { %p79_p3 = por %p78_p0, %p77_p13  ;;  %p807_p5 = por %p107_p2, %p77_p13 }
  0x17   : > { %s153_s7 = sand.u32 1, %s707_s14   ;;  %s499_s9 = sshll.u32 %s711_s15, 3 }
  0x18   : > { %s472_s8 = sshll.u32 %s153_s7, 3  ;;  %s162_s17 = scalar_lea.hbm %s918_s2, %s499_s9 }
  0x19   : > { %s157_s20 = scalar_lea.vmem [#allocation9], %s472_s8  ;;  %s164_s22 = sshll.u32 %s162_s17, 4  ;;  %s165_s22 = int_to_ptr.hbm [resolvable:$true] %s164_s22 }
  0x1a   : > { %s166_s21 = sshll.u32 %s157_s20, 4  ;;  %p817_p10 = pnand %p530_p7, %p79_p3  ;;  %s167_s21 = int_to_ptr.vmem [resolvable:$true] %s166_s21 }
  0x1b   : > { %s154_s25 = scalar_lea.sflag [#allocation4], %s153_s7  ;;  %s607_s26 = sshra.s32 %s165_s22, 4  ;;  %s608_s26 = int_to_ptr.hbm [resolvable:$true] %s607_s26 }
  0x1c   : > { %s609_s28 = scalar_lea.hbm %s608_s26, 8  ;;  %p611_p11 = pneg %p817_p10 }
  0x1d   : > { %p610_p2 = scmp.ne.s32.totalorder %s608_s26, %s609_s28  ;;  %s614_s4 = scalar_lea.hbm %s918_s2, 16 }
  0x1e   : > { %p615_p0 = scmp.lt.s32.totalorder %s608_s26, %s918_s2  ;;  %p616_p3 = scmp.lt.s32.totalorder %s614_s4, %s609_s28 }
  0x1f   : > { %p612_p12 = pnand %p611_p11, %p610_p2 }
  0x20   : > { %p617_p7 = por %p616_p3, %p615_p0 }
  0x21   : > { %p613_p13 = pneg %p612_p12 }
  0x23   : > { %p618_p9 = pnand %p617_p7, %p613_p13 }
  0x25   : > { %621 = shalt.err (!%p618_p9)
}
  0x26   : > { %523 = dma.hbm_to_vmem [thread:$0]  (!%p817_p10), %s165_s22, 128, %s167_s21, %s154_s25  }
  0x27   : > { %175 = sbr.rel (%p781_p8) target bundleno = 374 (0x176), region = 32 }
  0x2c   : > { %682 = dma.done.wait (%p84_p1), [#allocation6], 16  }
  0x2d   : > { %684 = vsyncadd (%p84_p1), [#allocation6], 4294967280 }
  0x2e   : > { %686 = dma.done.wait (%p84_p1), [#allocation7], 16  }
  0x2f   : > { %688 = vsyncadd (%p84_p1), [#allocation7], 4294967280  ;;  %s842_s7 = sand.u32 1, %s703_s13  }
  0x30   : > { %s478_s23 = sshll.u32 %s842_s7, 3  ;;  %s188_s10 = scalar_lea.sflag [#allocation4], %s842_s7 }
  0x31   : > { %s191_s11 = scalar_lea.vmem [#allocation9], %s478_s23 }
  0x32   : > { %690 = dma.done.wait (%p768_p4), %s188_s10, 128  }
  0x33   : > { %692 = vsyncadd (%p768_p4), %s188_s10, 4294967168 }
  0x34   : > { %197 = sfence }
  0x35   : > { %v852_v0 = vld [vmem:[%s191_s11] sm:$0xff]  ;;  %vm240_vm0 = vcmask 7168   ;;  %vm242_vm1 = vcmask 1024   ;;  %v715_v1 = vmov 0.0   ;;  %vm223_vm2 = vcmask 1043456   ;;  %s858_s18 = sld [smem:[#allocation3]] }
  0x36   : > { %218 = vst [vmem:[#allocation1] ss:$2 sm:$0xff] %v852_v0  ;;  %v716_v12 = vmov 0   ;;  %vm244_vm3 = vcmask 3072   ;;  %s860_s17 = sld [smem:[#allocation3 + $0x1]]  ;;  %s500_s29 = sshll.u32 %s759_s16, 3 }
  0x37   : > { %241 = vst.msk [vmem:[#allocation2] sm:$0xff] %vm240_vm0, %v715_v1  ;;  %571 = vset.pattern.permute.xlu1 %v716_v12  ;;  %572 = vset.pattern.permute.xlu0 %v716_v12  ;;  %s862_s20 = sld [smem:[#allocation3 + $0x2]]  ;;  %s368_s8 = scalar_lea.hbm %s919_s3, %s500_s29 }
  0x38   : > { %243 = vst.msk [vmem:[#allocation2 + $0x8] sm:$0x3] %vm242_vm1, %v715_v1  ;;  %s865_s21 = sld [smem:[#allocation3 + $0x3]]  ;;  %s215_s9 = scalar_lea.vmem [#allocation10], %s478_s23 }
  0x39   : > { %s869_s22 = sld [smem:[#allocation3 + $0x4]]  ;;  %s370_s10 = sshll.u32 %s215_s9, 4  ;;  %s371_s10 = int_to_ptr.vmem [resolvable:$true] %s370_s10 }
  0x3a   : > { %s875_s24 = sld [smem:[#allocation3 + $0x5]]  ;;  %s372_s11 = sshll.u32 %s368_s8, 4  ;;  %s373_s11 = int_to_ptr.hbm [resolvable:$true] %s372_s11 }
  0x3b   : > { %v248_v15 = vstv %s858_s18  ;;  %s485_s25 = sld [smem:[#allocation3 + $0x6]]  ;;  %s357_s18 = scalar_lea.sflag [#allocation5], %s842_s7 }
  0x3c   : > { %v252_v16 = vstv %s860_s17  ;;  %s319_s26 = sld [smem:[#allocation8]]  ;;  %s651_s17 = sshra.s32 %s373_s11, 4  ;;  %s652_s17 = int_to_ptr.hbm [resolvable:$true] %s651_s17 }
  0x3d   : > { %v219_v2 = vld.sshfl [vmem:[#allocation1] sm:$0xff pattern:$0x75316420]  ;;  %v220_v3 = vld.sshfl [vmem:[#allocation1 + $0x8] sm:$0xff pattern:$0x75316420]  ;;  %v257_v20 = vstv %s862_s20  ;;  %p658_p9 = scmp.lt.s32.totalorder %s652_s17, %s919_s3 }
  0x3e   : > { %v224_v4 = vsel %vm223_vm2, %v219_v2, 0.0  ;;  %v225_v5 = vsel %vm223_vm2, %v220_v3, 0.0  ;;  %230 = vst [vmem:[#allocation1] ss:$2 sm:$0xff] %v852_v0  ;;  %v262_v30 = vstv %s865_s21  ;;  %s492_s28 = sld [smem:[#allocation8 + $0x1]]  ;;  %s653_s16 = scalar_lea.hbm %s652_s17, 8 }
  0x3f   : > { %v226_v6 = vadd.f32 %v225_v5, %v224_v4  ;;  %v267_v33 = vstv %s869_s22  ;;  %p654_p1 = scmp.ne.s32.totalorder %s652_s17, %s653_s16  ;;  %s657_s23 = scalar_lea.hbm %s919_s3, 16 }
  0x40   : > { %v272_v36 = vstv %s875_s24  ;;  %p659_p10 = scmp.lt.s32.totalorder %s657_s23, %s653_s16 }
  0x41   : > { %227 = vadd.xlane.f32.xlu0 %v226_v6  ;;  %v277_v47 = vstv %s485_s25  ;;  %p655_p4 = pnand %p654_p1, %p807_p5 }
  0x42   : > { %p660_p2 = por %p659_p10, %p658_p9 }
  0x43   : > { %p656_p8 = pneg %p655_p4 }
  0x44   : > { %v323_v2 = vstv %s492_s28 }
  0x45   : > { %v231_v7 = vld.sshfl [vmem:[#allocation1] sm:$0xff pattern:$0x75316420]  ;;  %v232_v8 = vld.sshfl [vmem:[#allocation1 + $0x8] sm:$0xff pattern:$0x75316420]  ;;  %p661_p11 = pnand %p660_p2, %p656_p8 }
  0x46   : > { %v235_v9 = vsel %vm223_vm2, %v231_v7, -inf  ;;  %v236_v10 = vsel %vm223_vm2, %v232_v8, -inf }
  0x47   : > { %v237_v11 = vmax.f32 %v235_v9, %v236_v10 }
  0x49   : > { %238 = vmax.xlane.f32.xlu0 %v237_v11 }
  0xb4   : > { %v228_v13 = vpop.xlane.xlu0 %227 }
  0xb5   : > { %v229_v14 = vmul.f32 0.00390625, %v228_v13 }
  0xb7   : > { %245 = vst.msk [vmem:[#allocation2 + $0x3] sm:$0xf] %vm244_vm3, %v229_v14 }
  0xbc   : > { %v239_v27 = vpop.xlane.xlu0 %238 }
  0xbe   : > { %v247_v17 = vld [vmem:[#allocation2] sm:$0xf]  ;;  %v266_v22 = vld [vmem:[#allocation2 + $0x4] sm:$0xf] }
  0xbf   : > { %v251_v18 = vld [vmem:[#allocation2 + $0x1] sm:$0xf]  ;;  %v271_v23 = vld [vmem:[#allocation2 + $0x5] sm:$0xf]  ;;  %v249_v24 = vmul.f32 %v248_v15, %v247_v17  ;;  %v268_v35 = vmul.f32 %v267_v33, %v266_v22 }
  0xc0   : > { %v256_v19 = vld [vmem:[#allocation2 + $0x2] sm:$0xf]  ;;  %v253_v25 = vmul.f32 %v252_v16, %v251_v18  ;;  %v276_v26 = vld [vmem:[#allocation2 + $0x6] sm:$0xf]  ;;  %v273_v44 = vmul.f32 %v272_v36, %v271_v23 }
  0xc1   : > { %v261_v21 = vld [vmem:[#allocation2 + $0x3] sm:$0xf]  ;;  %v258_v29 = vmul.f32 %v257_v20, %v256_v19  ;;  %282 = vst.msk [vmem:[#allocation2 + $0x8] sm:$0x3] %vm242_vm1, %v715_v1  ;;  %v278_v53 = vmul.f32 %v277_v47, %v276_v26 }
  0xc2   : > { %281 = vst.msk [vmem:[#allocation2] sm:$0xff] %vm240_vm0, %v715_v1  ;;  %v254_v28 = vadd.f32 %v253_v25, %v249_v24  ;;  %v263_v32 = vmul.f32 %v262_v30, %v261_v21  ;;  %v320_v1 = vstv %s319_s26 }
  0xc3   : > { %283 = vst.msk [vmem:[#allocation2 + $0x3] sm:$0xf] %vm244_vm3, %v239_v27 }
  0xc4   : > { %v259_v31 = vadd.f32 %v258_v29, %v254_v28 }
  0xc6   : > { %v264_v34 = vadd.f32 %v263_v32, %v259_v31 }
  0xc8   : > { %v269_v40 = vadd.f32 %v268_v35, %v264_v34 }
  0xca   : > { %v285_v37 = vld [vmem:[#allocation2] sm:$0xf]  ;;  %v304_v48 = vld [vmem:[#allocation2 + $0x4] sm:$0xf]  ;;  %v274_v49 = vadd.f32 %v273_v44, %v269_v40 }
  0xcb   : > { %v289_v38 = vld [vmem:[#allocation2 + $0x1] sm:$0xf]  ;;  %v287_v41 = vmul.f32 %v285_v37, %v248_v15  ;;  %v309_v52 = vld [vmem:[#allocation2 + $0x5] sm:$0xf]  ;;  %v306_v55 = vmul.f32 %v304_v48, %v267_v33 }
  0xcc   : > { %v294_v39 = vld [vmem:[#allocation2 + $0x2] sm:$0xf]  ;;  %v291_v42 = vmul.f32 %v289_v38, %v252_v16  ;;  %v314_v56 = vld [vmem:[#allocation2 + $0x6] sm:$0xf]  ;;  %v279_v57 = vadd.f32 %v278_v53, %v274_v49  ;;  %v311_v59 = vmul.f32 %v309_v52, %v272_v36 }
  0xcd   : > { %v299_v43 = vld [vmem:[#allocation2 + $0x3] sm:$0xf]  ;;  %v296_v46 = vmul.f32 %v294_v39, %v257_v20  ;;  %v316_v61 = vmul.f32 %v314_v56, %v277_v47  ;;  %v717_v20 = vmov 839922192  }
  0xce   : > { %v292_v45 = vadd.f32 %v291_v42, %v287_v41  ;;  %v301_v51 = vmul.f32 %v299_v43, %v262_v30  ;;  %v280_v62 = vmax.f32 %v279_v57, 0.0  ;;  %v350_v21 = vunpack.c.l.s4 %v717_v20 }
  0xd0   : > { %v297_v50 = vadd.f32 %v296_v46, %v292_v45  ;;  %v321_v4 = vmul.f32 %v320_v1, %v280_v62  ;;  %v351_v22 = vunpack.c.0.s8 %v350_v21 }
  0xd2   : > { %v302_v54 = vadd.f32 %v301_v51, %v297_v50 }
  0xd4   : > { %v307_v58 = vadd.f32 %v306_v55, %v302_v54 }
  0xd6   : > { %v312_v60 = vadd.f32 %v311_v59, %v307_v58 }
  0xd8   : > { %v317_v63 = vadd.f32 %v316_v61, %v312_v60 }
  0xda   : > { %v318_v3 = vmax.f32 %v317_v63, 0.0 }
  0xdc   : > { %v324_v5 = vmul.f32 %v323_v2, %v318_v3 }
  0xde   : > { %v325_v6 = vadd.f32 %v324_v5, %v321_v4 }
  0xe0   : > { %v493_v7 = vmul.f32 -1.442695, %v325_v6 }
  0xe2   : > { %573 = vpow2.f32 %v493_v7 }
  0xe8   : > { %v574_v8 = vpop.eup %573 }
  0xe9   : > { %v329_v9 = vadd.f32 1.0, %v574_v8 }
  0xeb   : > { %575 = vrcp.f32 %v329_v9  ;;  %v341_v13 = vand.u32 2147483648, %v329_v9  ;;  %v339_v15 = vand.u32 2147483647, %v329_v9  ;;  %vm335_vm5 = vweird.f32 %v329_v9 }
  0xed   : > { %v342_v17 = vor.u32 1.1754944e-38, %v341_v13  ;;  %vm340_vm7 = vcmp.eq.f32.partialorder %v339_v15, 8.507059e+37 }
  0xf1   : > { %v576_v10 = vpop.eup %575 }
  0xf2   : > { %v331_v11 = vmul.f32 %v576_v10, %v329_v9  ;;  %vm336_vm4 = vweird.f32 %v576_v10 }
  0xf3   : > { %vm337_vm6 = vmor %vm335_vm5, %vm336_vm4 }
  0xf4   : > { %v332_v12 = vsub.f32 1.0, %v331_v11 }
  0xf6   : > { %v333_v14 = vmul.f32 %v576_v10, %v332_v12 }
  0xf8   : > { %v334_v16 = vadd.f32 %v576_v10, %v333_v14 }
  0xfa   : > { %v338_v18 = vsel %vm337_vm6, %v576_v10, %v334_v16 }
  0xfb   : > { %v343_v19 = vsel %vm340_vm7, %v342_v17, %v338_v18 }
  0xfc   : > { %347 = vperm.xlu1 %571, %v343_v19  }
 0x16e   : > { %v348_v23 = vpop.permute.xlu1 %347 }
 0x16f   : > { %v352_v24 = vperm.slane %v348_v23, %v351_v22 }
 0x171   : > { %v354_v25 = vmul.f32 %v352_v24, %v852_v0 }
 0x173   : > { %355 = vst [vmem:[%s215_s9] sm:$0xff] %v354_v25 }
 0x174   : > { %664 = shalt.err (!%p661_p11)
}
 0x175   : > { %511 = dma.vmem_to_hbm [thread:$0]  (%p807_p5), %s371_s10, 128, %s373_s11, %s357_s18  }
 0x176 PF: > { %s384_s7 = sand.u32 1, %s699_s12   ;;  %p925_p12 = scmp.ge.s32.totalorder %s711_s15, 2 }
 0x177   : > { %s385_s25 = scalar_lea.sflag [#allocation5], %s384_s7 }
 0x178   : > { %p525_p13 = pnand %p925_p12, %p773_p6 }
 0x17a   : > { %p526_p0 = pneg %p525_p13 }
 0x17c   : > { %694 = dma.done.wait (%p526_p0), %s385_s25, 128  }
 0x17d   : > { %696 = vsyncadd (%p526_p0), %s385_s25, 4294967168  ;;  %p18_p3 = scmp.ge.s32.totalorder %s794_s27, 4   ;;  %s926_s12 = smov %s703_s13 }
 0x17e   : > { %s927_s13 = smov %s707_s14  ;;  %s928_s14 = smov %s803_s5 }
 0x17f   : > { %s929_s15 = smov %s794_s27  ;;  %20 = sbr.rel (!%p18_p3) target bundleno = 7 (0x7), region = 87 }
 0x184   :  { %391 = vsyncpa [#allocation4], 1 }
 0x185   :  { %393 = vsyncpa [#allocation4 + $0x1], 1 }
 0x186   :  { %394 = vsyncpa [#allocation5], 1 }
 0x187   :  { %396 = vsyncpa [#allocation5 + $0x1], 1 }
 0x188   :  { %397 = vsyncpa [#allocation6], 1 }
 0x189   :  { %399 = vsyncpa [#allocation6 + $0x1], 1 }
 0x18a   :  { %400 = vsyncpa [#allocation7], 1 }
 0x18b   :  { %402 = vsyncpa [#allocation7 + $0x1], 1 }

</bundles_post_ra>
